<compile_context>
chip_gen: v6e
topology: v6e:2x2x1
jax: 0.10.0
libtpu: 0.0.40
codegen_flags: <defaults>
</compile_context>

<pallas_src>
import functools

import jax
import jax.numpy as jnp
from jax import lax
from jax.experimental import pallas as pl
from jax.experimental.pallas import tpu as pltpu

LANE = 128           # lane-padded channel width (unmasked stores, full MXU columns)
NEG_SLOPE = 0.2
MASK_VAL = -1e30     # logit fill for non-edges: exp(MASK_VAL - m_new) underflows to exactly 0
M_INIT = -1e20       # running-max init; >> MASK_VAL so all-masked rows never give exp(0)=1


def _pick_tile(n_pad, cap):
    """Largest multiple of LANE <= cap that divides n_pad (n_pad % LANE == 0)."""
    t = min(cap, n_pad)
    while n_pad % t:
        t -= LANE
    return t


@functools.lru_cache(maxsize=None)
def _exp_dtype():
    """bf16 exp on v6e/v7x (bf16 EUP, ~2x); f32 on v5e and older (no bf16 EUP)."""
    try:
        kind = jax.devices()[0].device_kind.lower()
    except Exception:
        return jnp.float32
    return jnp.bfloat16 if any(t in kind for t in ("v6", "v7", "7x")) else jnp.float32


# ----------------------------------------------------------------------------
# Projection kernel: H[r] = X @ W_aug[r] in bf16, hoisted out of the dst loop.
# Also extracts the per-node attention scalars q (dst side) / k (src side).
# ----------------------------------------------------------------------------
def _project_kernel(x_ref, w_ref, h_ref, q_ref, k_ref, *, c_out):
    h = jnp.dot(x_ref[...], w_ref[0], preferred_element_type=jnp.float32)   # [t, LANE] f32
    lane = lax.broadcasted_iota(jnp.int32, h.shape, 1)
    # zero the fused q/k columns & padding so downstream aggregation stays clean
    h_ref[0] = jnp.where(lane < c_out, h, 0.0).astype(h_ref.dtype)
    q_ref[0] = h[:, c_out:c_out + 1]          # [t, 1]
    k_ref[0] = h[:, c_out + 1:c_out + 2]      # [t, 1]


def rgat_relation_project(x_bf16, w_aug, *, c_out, t_cap=512):
    """H[r] (bf16, [R,N_pad,LANE]), q ([R,N_pad,1] f32), k ([R,1,N_pad] f32)."""
    R = w_aug.shape[0]
    n_pad = x_bf16.shape[0]
    t = _pick_tile(n_pad, t_cap)
    h_all, q_all, k_col = pl.pallas_call(
        functools.partial(_project_kernel, c_out=c_out),
        out_shape=(jax.ShapeDtypeStruct((R, n_pad, LANE), jnp.bfloat16),
                   jax.ShapeDtypeStruct((R, n_pad, 1), jnp.float32),
                   jax.ShapeDtypeStruct((R, n_pad, 1), jnp.float32)),
        grid=(n_pad // t, R),                       # node tile outer -> X stays resident
        in_specs=[pl.BlockSpec((t, LANE), lambda i, r: (i, 0)),
                  pl.BlockSpec((1, LANE, LANE), lambda i, r: (r, 0, 0))],
        out_specs=(pl.BlockSpec((1, t, LANE), lambda i, r: (r, i, 0)),
                   pl.BlockSpec((1, t, 1), lambda i, r: (r, i, 0)),
                   pl.BlockSpec((1, t, 1), lambda i, r: (r, i, 0))),
        compiler_params=pltpu.CompilerParams(
            dimension_semantics=("parallel", "arbitrary")),
    )(x_bf16, w_aug)
    # [R, N, 1] -> [R, 1, N] keeps the same linear order (cheap relabel) and gives a
    # lane-major k row, removing the per-step sublane<->lane transpose in the conv kernel.
    return h_all, q_all, k_col.reshape(R, 1, n_pad)


# ----------------------------------------------------------------------------
# RGATConv attention + aggregation kernel.
# Grid = (dst_tile [parallel], relation [arbitrary], src_tile [arbitrary]);
# online softmax across (relation, src) with per-dst-tile VMEM accumulators.
# Optionally fuses the final Linear into the finalize step (second layer).
# ----------------------------------------------------------------------------
def _rgat_conv_kernel(nnz_ref, h_ref, q_ref, k_ref, a_ref, b_ref, *rest,
                      fuse_linear, exp_dtype):
    if fuse_linear:
        lw_ref, lb_ref, o_ref, m_sc, l_sc, acc_sc = rest
    else:
        o_ref, m_sc, l_sc, acc_sc = rest

    d = pl.program_id(0)
    r = pl.program_id(1)
    s = pl.program_id(2)
    nd = pl.num_programs(0)
    nr = pl.num_programs(1)
    ns = pl.num_programs(2)

    @pl.when((r == 0) & (s == 0))
    def _init():
        m_sc[...] = jnp.full_like(m_sc, M_INIT)
        l_sc[...] = jnp.zeros_like(l_sc)
        acc_sc[...] = jnp.zeros_like(acc_sc)

    # Skip all compute for adjacency tiles with no edges: their contribution is
    # exactly zero (p underflows to 0), so skipping preserves the online softmax.
    # TODO(synk): full tile skipping (skipping the DMA too) needs a data-dependent
    # index_map over a compacted non-empty tile list.
    nnz = nnz_ref[(r * nd + d) * ns + s]

    @pl.when(nnz > 0)
    def _step():
        # additive attention logit for edge (src j -> dst i): leaky_relu(q_i + k_j)
        raw = q_ref[0] + k_ref[0]                                    # [t_dst, t_src] f32
        logit = jnp.where(a_ref[0] != 0,
                          jnp.maximum(raw, NEG_SLOPE * raw),         # leaky relu
                          MASK_VAL)
        m_prev = m_sc[...]
        m_new = jnp.maximum(m_prev, jnp.max(logit, axis=1, keepdims=True))  # [t_dst,1]
        corr = jnp.exp(m_prev - m_new)
        # max-subtraction stays in f32 so MASK_VAL rows underflow to exactly 0.
        p = jnp.exp((logit - m_new).astype(exp_dtype))
        l_sc[...] = corr * l_sc[...] + jnp.sum(p.astype(jnp.float32), axis=1,
                                               keepdims=True)
        # aggregation matmul (dominant FLOP term): bf16 inputs, f32 accumulation
        acc_sc[...] = corr * acc_sc[...] + jnp.dot(
            p.astype(jnp.bfloat16), h_ref[0], preferred_element_type=jnp.float32)
        m_sc[...] = m_new

    @pl.when((r == nr - 1) & (s == ns - 1))
    def _finalize():
        denom = jnp.where(l_sc[...] > 0.0, l_sc[...], 1.0)   # isolated dst -> relu(bias)
        h_out = acc_sc[...] * pl.reciprocal(denom, approx=True) + b_ref[...]
        h_out = jnp.maximum(h_out, 0.0)                      # fused ReLU
        if fuse_linear:                                      # fused final Linear (conv2)
            y = jnp.dot(h_out.astype(jnp.bfloat16), lw_ref[...],
                        preferred_element_type=jnp.float32) + lb_ref[...]
            o_ref[...] = y.astype(o_ref.dtype)
        else:
            o_ref[...] = h_out.astype(o_ref.dtype)


def rgat_conv(x_bf16, adj_i8, nnz_flat, w_aug, b_pad, *, c_out, t_dst, t_src,
              lin_w=None, lin_b=None):
    """One RGATConv layer (+ReLU, optionally +Linear) on lane-padded features.

    x_bf16: [N_pad, LANE] bf16     adj_i8: [R, N_pad, N_pad] int8
    w_aug:  [R, LANE, LANE] bf16 (fused q/k columns, zero-padded)
    b_pad:  [1, LANE] f32          nnz_flat: [R*nd*ns] int32 per-tile edge counts
    """
    R, n_pad, _ = adj_i8.shape
    nd, ns = n_pad // t_dst, n_pad // t_src
    fuse_linear = lin_w is not None

    h_all, q_all, k_rows = rgat_relation_project(x_bf16, w_aug, c_out=c_out)

    in_specs = [
        pl.BlockSpec((1, t_src, LANE), lambda d, r, s, nz: (r, s, 0)),   # H[r] src tile (bf16)
        pl.BlockSpec((1, t_dst, 1), lambda d, r, s, nz: (r, d, 0)),      # q column (dst)
        pl.BlockSpec((1, 1, t_src), lambda d, r, s, nz: (r, 0, s)),      # k row (src)
        pl.BlockSpec((1, t_dst, t_src), lambda d, r, s, nz: (r, d, s)),  # A[r] tile (int8)
        pl.BlockSpec((1, LANE), lambda d, r, s, nz: (0, 0)),             # bias
    ]
    operands = [h_all, q_all, k_rows, adj_i8, b_pad]
    if fuse_linear:
        in_specs += [pl.BlockSpec((LANE, LANE), lambda d, r, s, nz: (0, 0)),
                     pl.BlockSpec((1, LANE), lambda d, r, s, nz: (0, 0))]
        operands += [lin_w, lin_b]
        out_dtype = jnp.float32      # final output
    else:
        out_dtype = jnp.bfloat16     # hidden activation feeds the next bf16 projection

    grid_spec = pltpu.PrefetchScalarGridSpec(
        num_scalar_prefetch=1,
        grid=(nd, R, ns),
        in_specs=in_specs,
        out_specs=pl.BlockSpec((t_dst, LANE), lambda d, r, s, nz: (d, 0)),
        scratch_shapes=[pltpu.VMEM((t_dst, 1), jnp.float32),      # running max
                        pltpu.VMEM((t_dst, 1), jnp.float32),      # running denom
                        pltpu.VMEM((t_dst, LANE), jnp.float32)],  # running numerator
    )
    kernel = functools.partial(_rgat_conv_kernel,
                               fuse_linear=fuse_linear, exp_dtype=_exp_dtype())
    return pl.pallas_call(
        kernel,
        out_shape=jax.ShapeDtypeStruct((n_pad, LANE), out_dtype),
        grid_spec=grid_spec,
        # Working set at the default 512x512 tiles is a few MiB, far below the scoped
        # VMEM default on every gen; raise vmem_limit_bytes only if tile caps are
        # pushed toward 1024 on v7x (64 MiB physical VMEM).
        compiler_params=pltpu.CompilerParams(
            dimension_semantics=("parallel", "arbitrary", "arbitrary")),
    )(nnz_flat, *operands)


# ----------------------------------------------------------------------------
# Full RGAT forward on padded operands.
# ----------------------------------------------------------------------------
def rgat_forward(x, adj_i8, params, *, t_dst_cap=512, t_src_cap=512):
    n, c_in = x.shape
    R, n_pad, _ = adj_i8.shape
    x_pad = jnp.pad(x, ((0, n_pad - n), (0, LANE - c_in))).astype(jnp.bfloat16)

    t_dst = _pick_tile(n_pad, t_dst_cap)
    if n_pad // t_dst < 2 and n_pad >= 2 * LANE:
        # keep >= 2 dst tiles so the "parallel" axis can shard over v7x's 2 TensorCores
        t_dst = _pick_tile(n_pad, n_pad // 2)
    t_src = _pick_tile(n_pad, t_src_cap)
    nd, ns = n_pad // t_dst, n_pad // t_src

    # per-(relation, dst tile, src tile) edge counts for empty-tile skipping
    # TODO(synk): for large sparse graphs build this (and a compacted non-empty tile
    # list for data-dependent index_maps) straight from the edge list instead of the
    # dense O(R*N^2) adjacency.
    nnz_flat = adj_i8.reshape(R, nd, t_dst, ns, t_src).sum(
        axis=(2, 4), dtype=jnp.int32).reshape(-1)

    w1, b1 = params["conv1"]
    w2, b2 = params["conv2"]
    h = rgat_conv(x_pad, adj_i8, nnz_flat, w1, b1, c_out=params["hid"],
                  t_dst=t_dst, t_src=t_src)                        # conv1 + ReLU (bf16)
    y = rgat_conv(h, adj_i8, nnz_flat, w2, b2, c_out=params["hid"],
                  t_dst=t_dst, t_src=t_src,
                  lin_w=params["lin_w"], lin_b=params["lin_b"])    # conv2 + ReLU + Linear
    # node_emb[:, 0, :] in the reference is identity on the 2-D [N, out] result;
    # also drop the node / lane padding here.
    return y[:n, :params["out"]]


# ----------------------------------------------------------------------------
# Pure-JAX dense reference (unpadded, f32) for a sanity check.
# ----------------------------------------------------------------------------
def _rgat_conv_ref(x, adj, w, q, k, b):
    h = jnp.einsum('nc,rch->rnh', x, w)
    qv = jnp.einsum('rnh,ho->rno', h, q)[..., 0]
    kv = jnp.einsum('rnh,ho->rno', h, k)[..., 0]
    s = qv[:, :, None] + kv[:, None, :]
    s = jnp.where(s >= 0, s, NEG_SLOPE * s)
    s = jnp.where(adj > 0, s, -jnp.inf)
    m = jnp.max(s, axis=(0, 2), keepdims=True)
    m = jnp.where(jnp.isfinite(m), m, 0.0)
    p = jnp.where(adj > 0, jnp.exp(s - m), 0.0)
    denom = jnp.sum(p, axis=(0, 2), keepdims=True)
    denom = jnp.where(denom > 0, denom, 1.0)
    out = jnp.einsum('rij,rjh->ih', p / denom, h) + b
    return jnp.maximum(out, 0.0)


def _rgat_forward_ref(x, adj, params):
    h = _rgat_conv_ref(x, adj, *params["conv1"])
    h = _rgat_conv_ref(h, adj, *params["conv2"])
    return h @ params["lin_w_t"] + params["lin_b"]


# ----------------------------------------------------------------------------
# Parameter init (RGATConv / Linear shapes) and kernel-side param packing.
# ----------------------------------------------------------------------------
def init_conv(key, c_in, c_out, num_rel):
    k1, k2, k3 = jax.random.split(key, 3)
    w = jax.random.normal(k1, (num_rel, c_in, c_out), jnp.float32) / jnp.sqrt(c_in)
    q = jax.random.normal(k2, (c_out, 1), jnp.float32) / jnp.sqrt(c_out)  # heads*dim = 1
    k = jax.random.normal(k3, (c_out, 1), jnp.float32) / jnp.sqrt(c_out)
    b = jnp.zeros((1, c_out), jnp.float32)
    return w, q, k, b


def fuse_conv_params(w, q, k, b):
    """W_aug[r] = [W_r | W_r@q | W_r@k | 0] zero-padded to [LANE, LANE], stored bf16."""
    num_rel, c_in, c_out = w.shape
    assert c_in <= LANE and c_out + 2 <= LANE
    w_aug = jnp.concatenate([w, w @ q, w @ k], axis=-1)          # [R, Cin, Cout+2]
    w_aug = jnp.pad(w_aug, ((0, 0), (0, LANE - c_in), (0, LANE - (c_out + 2))))
    b_pad = jnp.pad(b, ((0, 0), (0, LANE - c_out)))
    return w_aug.astype(jnp.bfloat16), b_pad


if __name__ == "__main__":
    N, C_IN, HID, C_OUT, R, E = 16, 8, 32, 4, 3, 40

    key = jax.random.PRNGKey(0)
    kx, ke, kt, kp1, kp2, kw, kb = jax.random.split(key, 7)

    # node features
    x = jax.random.normal(kx, (N, C_IN), jnp.float32)

    # unique random edges (src -> dst) with a relation type each
    flat = jax.random.permutation(ke, N * N)[:E]
    dst, src = flat // N, flat % N
    edge_index = jnp.stack([src, dst]).astype(jnp.int32)        # [2, E]
    edge_type = jax.random.randint(kt, (E,), 0, R, jnp.int32)   # [E]

    # glue: sparse edge list -> dense per-relation adjacency A[r, dst, src], int8,
    # node dim zero-padded to a multiple of 128 so blocks stay (8,128)/(32,128)-legal.
    n_pad = ((N + LANE - 1) // LANE) * LANE
    adj = jnp.zeros((R, n_pad, n_pad), jnp.int8).at[edge_type, dst, src].set(1)

    conv1_raw = init_conv(kp1, C_IN, HID, R)
    conv2_raw = init_conv(kp2, HID, HID, R)
    lin_w = jax.random.normal(kw, (C_OUT, HID), jnp.float32) / jnp.sqrt(HID)  # torch [out,in]
    lin_b = 0.01 * jax.random.normal(kb, (C_OUT,), jnp.float32)

    params = {
        "conv1": fuse_conv_params(*conv1_raw),
        "conv2": fuse_conv_params(*conv2_raw),
        # [LANE, LANE] bf16: rows >= HID and cols >= C_OUT zero-padded
        "lin_w": jnp.pad(lin_w.T, ((0, LANE - HID), (0, LANE - C_OUT))).astype(jnp.bfloat16),
        "lin_b": jnp.pad(lin_b.reshape(1, C_OUT), ((0, 0), (0, LANE - C_OUT))),
        "hid": HID,
        "out": C_OUT,
    }

    out = jax.block_until_ready(rgat_forward(x, adj, params))

    ref_params = {"conv1": conv1_raw, "conv2": conv2_raw,
                  "lin_w_t": lin_w.T, "lin_b": lin_b.reshape(1, C_OUT)}
    ref = jax.block_until_ready(_rgat_forward_ref(x, adj[:, :N, :N], ref_params))

    assert out.shape == (N, C_OUT), out.shape
    # bf16 projections / activations / aggregation + approx reciprocal vs f32 reference
    assert jnp.allclose(out, ref, rtol=6e-2, atol=6e-2), (out, ref)
    print("KERNEL_OK")
</pallas_src>

<mosaic_0001>
module attributes {stable_mosaic.version = 11 : i64} {
  func.func @_project_kernel(%arg0: i32, %arg1: i32, %arg2: memref<128x128xbf16, #tpu.memory_space<vmem>>, %arg3: memref<1x128x128xbf16, #tpu.memory_space<vmem>>, %arg4: memref<1x128x128xbf16, #tpu.memory_space<vmem>>, %arg5: memref<1x128x1xf32, #tpu.memory_space<vmem>>, %arg6: memref<1x128x1xf32, #tpu.memory_space<vmem>>) attributes {dimension_semantics = [#tpu.dimension_semantics<parallel>, #tpu.dimension_semantics<arbitrary>], iteration_bounds = array<i64: 1, 3>, scalar_prefetch = 0 : i64, scratch_operands = 0 : i64, tpu.core_type = #tpu.core_type<tc>, window_params = [{transform_indices = @transform_0, window_bounds = array<i64: 128, 128>}, {transform_indices = @transform_1, window_bounds = array<i64: 1, 128, 128>}, {transform_indices = @transform_2, window_bounds = array<i64: 1, 128, 128>}, {transform_indices = @transform_3, window_bounds = array<i64: 1, 128, 1>}, {transform_indices = @transform_4, window_bounds = array<i64: 1, 128, 1>}]} {
    %c0 = arith.constant 0 : index
    %c0_0 = arith.constant 0 : index
    %0 = vector.load %arg2[%c0, %c0_0] : memref<128x128xbf16, #tpu.memory_space<vmem>>, vector<128x128xbf16>
    %c0_1 = arith.constant 0 : index
    %c0_2 = arith.constant 0 : index
    %c0_3 = arith.constant 0 : index
    %1 = vector.load %arg3[%c0_1, %c0_2, %c0_3] : memref<1x128x128xbf16, #tpu.memory_space<vmem>>, vector<1x128x128xbf16>
    %2 = vector.shape_cast %1 : vector<1x128x128xbf16> to vector<128x128xbf16>
    %cst = arith.constant dense<0.000000e+00> : vector<128x128xf32>
    %3 = tpu.matmul %0, %2, %cst {dimension_numbers = #tpu.dot_dimension_numbers<[1], [0], [0], [1], [0, 0, 1, 1], [], []>} : vector<128x128xbf16>, vector<128x128xbf16>, vector<128x128xf32> -> vector<128x128xf32>
    %4 = tpu.iota {dimensions = array<i32: 1>} : vector<128x128xi32>
    %c32_i32 = arith.constant 32 : i32
    %5 = vector.broadcast %c32_i32 : i32 to vector<128x128xi32>
    %6 = arith.cmpi slt, %4, %5 : vector<128x128xi32>
    %cst_4 = arith.constant 0.000000e+00 : f32
    %7 = vector.broadcast %cst_4 : f32 to vector<128x128xf32>
    %8 = arith.select %6, %3, %7 : vector<128x128xi1>, vector<128x128xf32>
    %9 = arith.truncf %8 : vector<128x128xf32> to vector<128x128xbf16>
    %c0_5 = arith.constant 0 : index
    %c0_6 = arith.constant 0 : index
    %c0_7 = arith.constant 0 : index
    %10 = vector.load %arg4[%c0_5, %c0_6, %c0_7] : memref<1x128x128xbf16, #tpu.memory_space<vmem>>, vector<1x128x128xbf16>
    %11 = vector.shape_cast %10 : vector<1x128x128xbf16> to vector<128x128xbf16>
    %12 = vector.shape_cast %9 : vector<128x128xbf16> to vector<1x128x128xbf16>
    tpu.vector_store %arg4[%c0_5, %c0_6, %c0_7], %12 {strides = array<i32>} : memref<1x128x128xbf16, #tpu.memory_space<vmem>>, vector<1x128x128xbf16>,
    %13 = vector.extract_strided_slice %3 {offsets = [0, 32], sizes = [128, 1], strides = [1, 1]} : vector<128x128xf32> to vector<128x1xf32>
    %c0_8 = arith.constant 0 : index
    %c0_9 = arith.constant 0 : index
    %c0_10 = arith.constant 0 : index
    %14 = vector.load %arg5[%c0_8, %c0_9, %c0_10] : memref<1x128x1xf32, #tpu.memory_space<vmem>>, vector<1x128x1xf32>
    %15 = vector.shape_cast %14 : vector<1x128x1xf32> to vector<128x1xf32>
    %16 = vector.shape_cast %13 : vector<128x1xf32> to vector<1x128x1xf32>
    tpu.vector_store %arg5[%c0_8, %c0_9, %c0_10], %16 {strides = array<i32>} : memref<1x128x1xf32, #tpu.memory_space<vmem>>, vector<1x128x1xf32>,
    %17 = vector.extract_strided_slice %3 {offsets = [0, 33], sizes = [128, 1], strides = [1, 1]} : vector<128x128xf32> to vector<128x1xf32>
    %c0_11 = arith.constant 0 : index
    %c0_12 = arith.constant 0 : index
    %c0_13 = arith.constant 0 : index
    %18 = vector.load %arg6[%c0_11, %c0_12, %c0_13] : memref<1x128x1xf32, #tpu.memory_space<vmem>>, vector<1x128x1xf32>
    %19 = vector.shape_cast %18 : vector<1x128x1xf32> to vector<128x1xf32>
    %20 = vector.shape_cast %17 : vector<128x1xf32> to vector<1x128x1xf32>
    tpu.vector_store %arg6[%c0_11, %c0_12, %c0_13], %20 {strides = array<i32>} : memref<1x128x1xf32, #tpu.memory_space<vmem>>, vector<1x128x1xf32>,
    return
  }
  func.func @transform_0(%arg0: i32, %arg1: i32) -> (i32, i32) {
    %c0_i32 = arith.constant 0 : i32
    %c0_i32_0 = arith.constant 0 : i32
    return %arg0, %c0_i32 : i32, i32
  }
  func.func @transform_1(%arg0: i32, %arg1: i32) -> (i32, i32, i32) {
    %c0_i32 = arith.constant 0 : i32
    %c0_i32_0 = arith.constant 0 : i32
    %c0_i32_1 = arith.constant 0 : i32
    return %arg1, %c0_i32, %c0_i32_0 : i32, i32, i32
  }
  func.func @transform_2(%arg0: i32, %arg1: i32) -> (i32, i32, i32) {
    %c0_i32 = arith.constant 0 : i32
    %c0_i32_0 = arith.constant 0 : i32
    return %arg1, %arg0, %c0_i32 : i32, i32, i32
  }
  func.func @transform_3(%arg0: i32, %arg1: i32) -> (i32, i32, i32) {
    %c0_i32 = arith.constant 0 : i32
    %c0_i32_0 = arith.constant 0 : i32
    return %arg1, %arg0, %c0_i32 : i32, i32, i32
  }
  func.func @transform_4(%arg0: i32, %arg1: i32) -> (i32, i32, i32) {
    %c0_i32 = arith.constant 0 : i32
    %c0_i32_0 = arith.constant 0 : i32
    return %arg1, %arg0, %c0_i32 : i32, i32, i32
  }
}

</mosaic_0001>

<bundles_post_ra>
// kernel: tpu_custom_call.1
= control target key start
LH: loop header
LB: loop body
LE: loop exit
PB: predicated region body
PF: predicated region fallthrough
CT: control target
= control target key end

     0   :  { %s1793_s0 = inlined_call_operand.hbm [shape: bf16[128,128], index: 0, kind: input, shape index: {}]   ;;  %s1794_s1 = inlined_call_operand.hbm [shape: bf16[3,128,128], index: 1, kind: input, shape index: {}]   ;;  %s1795_s2 = inlined_call_operand.hbm [shape: bf16[3,128,128], index: 2, kind: output, shape index: {0}]   ;;  %s1796_s3 = inlined_call_operand.vmem [shape: f32[3,128,1], index: 3, kind: output, shape index: {1}]   ;;  %s1797_s4 = inlined_call_operand.vmem [shape: f32[3,128,1], index: 4, kind: output, shape index: {2}]  }
   0x1   :  { %1801 = sst [smem:[#allocation11_spill]] %s1793_s0 }
   0x2   :  { %10 = vsyncpa [#allocation3], 0 }
   0x3   :  { %11 = vsyncpa [#allocation6], 0 }
   0x4   :  { %13 = vsyncpa [#allocation6 + $0x1], 0 }
   0x5   :  { %14 = vsyncpa [#allocation4], 0 }
   0x6   :  { %16 = vsyncpa [#allocation4 + $0x1], 0  ;;  %s1439_s15 = smov 0   ;;  %s1441_s16 = smov 0  }
   0x7   :  { %s1443_s17 = smov 0   ;;  %s1445_s18 = smov 0  }
   0x8   :  { %s1447_s19 = smov 0   ;;  %s1449_s20 = smov 0  }
   0x9 LB: > { %s986_s21 = sadd.s32 4294967295, %s1403_s20   ;;  %s987_s22 = sadd.s32 4294967294, %s1403_s20   ;;  %s1403_s20 = sphi %s1449_s20, %s22_s20   ;;  %s1399_s19 = sphi %s1447_s19, %s1820_s19   ;;  %s1395_s18 = sphi %s1445_s18, %s1819_s18   ;;  %s1391_s17 = sphi %s1443_s17, %s1818_s17   ;;  %s1387_s16 = sphi %s1441_s16, %s1817_s16   ;;  %s1383_s15 = sphi %s1439_s15, %s1816_s15  }
   0xa   : > { %p80_p0 = scmp.ne.s32.totalorder %s1387_s16, %s1383_s15  ;;  %p1473_p1 = scmp.eq.s32.totalorder %s986_s21, 0 }
   0xb   : > { %p1477_p2 = scmp.eq.s32.totalorder %s986_s21, 2  ;;  %p112_p3 = scmp.eq.s32.totalorder %s987_s22, 2 }
   0xc   : > { %p1483_p4 = por %p1473_p1, %p80_p0  ;;  %p988_p5 = scmp.ge.s32.totalorder %s1403_s20, 1 }
   0xd   : > { %p1488_p6 = por %p112_p3, %p80_p0  ;;  %p175_p7 = scmp.lt.s32.totalorder %s1403_s20, 4 }
   0xe   : > { %s1405_s28 = smov [#allocation2]   ;;  %s31_s5 = sadd.s32 1, %s1399_s19 }
   0xf   : > { %s1805_s26 = scalar_select %p1488_p6, 1, 0 }
  0x10   : > { %p1493_p8 = pnand %p988_p5, %p175_p7  ;;  %s190_s29 = sshll.u32 %s1405_s28, 4  ;;  %s191_s29 = int_to_ptr.vmem [resolvable:$true] %s190_s29 }
  0x11   : > { %s1276_s6 = scalar_lea.vmem %s191_s29, 1024  ;;  %p1284_p3 = scmp.lt.s32.totalorder %s191_s29, %s191_s29 }
  0x12   : > { %p1178_p9 = pneg %p1493_p8  ;;  %p1277_p12 = scmp.ne.s32.totalorder %s191_s29, %s1276_s6 }
  0x13   : > { %p1285_p5 = scmp.lt.s32.totalorder %s1276_s6, %s1276_s6 }
  0x14   : > { %p1501_p10 = pnand %p1178_p9, %p1473_p1 }
  0x15   : > { %p1286_p7 = por %p1285_p5, %p1284_p3 }
  0x16   : > { %p1267_p11 = pneg %p1501_p10 }
  0x18   : > { %p1279_p13 = pnand %p1277_p12, %p1267_p11 }
  0x1a   : > { %p1280_p0 = pneg %p1279_p13 }
  0x1c   : > { %p1287_p6 = pnand %p1286_p7, %p1280_p0 }
  0x1e   : > { %1290 = shalt.err (!%p1287_p6)
}
  0x1f   : > { %s1798_s7 = smov 64   ;;  %s1799_s8 = smov 4  }
  0x20   : > { %s1808_s0 = sld [smem:[#allocation11_spill]]  ;;  %p32_p6 = scmp.ge.s32.totalorder %s31_s5, 3 }
  0x21   : > { %s67_s11 = sadd.s32 1, %s1391_s17  ;;  %p74_p9 = scmp.ne.s32.totalorder %s1391_s17, %s1387_s16 }
  0x22   : > { %p75_p11 = scmp.eq.s32.totalorder %s1403_s20, 0  ;;  %s1822_s5 = smov (%p32_p6, %s31_s5), 0 }
  0x23   : > { %p1528_p13 = por %p1477_p2, %p74_p9  ;;  %s64_s14 = ssub.s32 %s1399_s19, %s1822_s5 }
  0x24   : > { %p1522_p12 = por %p75_p11, %p74_p9  ;;  %p1191_p0 = scmp.lt.s32.totalorder %s1403_s20, 3 }
  0x25   : > { %s1810_s13 = scalar_select %p1528_p13, 1, 0 }
  0x26   : > { %1181 = dma.hbm_to_vmem [thread:$0]  (!%p1501_p10), %s1808_s0, 1024, %s191_s29, [#allocation3], %s1798_s7, %s1798_s7, %s1799_s8  }
  0x27   : > { %p65_p10 = scmp.eq.s32.totalorder %s64_s14, 0  ;;  %s204_s21 = sand.u32 1, %s1391_s17  }
  0x28   : > { %s991_s22 = sshll.u32 %s204_s21, 6  ;;  %s1039_s29 = sshll.u32 %s1399_s19, 10 }
  0x29   : > { %s1537_s28 = scalar_select %p65_p10, %s1391_s17, %s67_s11  }
  0x2a   : > { %s214_s9 = scalar_lea.hbm %s1794_s1, %s1039_s29  ;;  %s208_s10 = scalar_lea.vmem [#allocation5], %s991_s22 }
  0x2b   : > { %s215_s7 = sshll.u32 %s208_s10, 4  ;;  %p1545_p2 = pnand %p1191_p0, %p1522_p12  ;;  %s216_s7 = int_to_ptr.vmem [resolvable:$true] %s215_s7 }
  0x2c   : > { %s205_s8 = scalar_lea.sflag [#allocation6], %s204_s21  ;;  %s1304_s14 = scalar_lea.vmem %s216_s7, 1024 }
  0x2d   : > { %p1293_p3 = pneg %p1545_p2  ;;  %p1305_p5 = scmp.ne.s32.totalorder %s216_s7, %s1304_s14 }
  0x2e   : > { %s1408_s11 = smov [#allocation5]  }
  0x2f   : > { %p1307_p7 = pnand %p1305_p5, %p1293_p3  ;;  %s1309_s0 = sshll.u32 %s1408_s11, 4  ;;  %s1310_s0 = int_to_ptr.vmem [resolvable:$false] %s1309_s0 }
  0x30   : > { %s1311_s29 = scalar_lea.vmem %s1310_s0, 2048  ;;  %p1312_p9 = scmp.lt.s32.totalorder %s216_s7, %s1310_s0 }
  0x31   : > { %p1308_p6 = pneg %p1307_p7  ;;  %p1313_p11 = scmp.lt.s32.totalorder %s1311_s29, %s1304_s14 }
  0x33   : > { %p1314_p10 = por %p1313_p11, %p1312_p9 }
  0x35   : > { %p1315_p13 = pnand %p1314_p10, %p1308_p6 }
  0x37   : > { %1318 = shalt.err (!%p1315_p13)
}
  0x38   : > { %s1812_s12 = smov 4   ;;  %s1813_s22 = smov 64  }
  0x39   : > { %1185 = dma.hbm_to_vmem [thread:$0]  (!%p1545_p2), %s214_s9, 1024, %s216_s7, %s205_s8, %s1813_s22, %s1813_s22, %s1812_s12  }
  0x3a   : > { %227 = sbr.rel (%p1493_p8) target bundleno = 478 (0x1de), region = 28 }
  0x3f   : > { %1370 = dma.done.wait (%p1473_p1), [#allocation3], 1024  }
  0x40   : > { %1372 = vsyncadd (%p1473_p1), [#allocation3], 4294966272  ;;  %s1563_s0 = sand.u32 1, %s1387_s16  }
  0x41   : > { %s996_s21 = sshll.u32 %s1563_s0, 6  ;;  %s234_s30 = scalar_lea.sflag [#allocation6], %s1563_s0 }
  0x42   : > { %s1569_s7 = scalar_lea.vmem [#allocation5], %s996_s21 }
  0x43   : > { %1374 = dma.done.wait (%p1483_p4), %s234_s30, 1024  }
  0x44   : > { %1376 = vsyncadd (%p1483_p4), %s234_s30, 4294966272  ;;  %v1249_v0 = vld [vmem:[%s1569_s7 + $0x38] sm:$0xff]   ;;  %v1250_v1 = vld [vmem:[%s1569_s7 + $0x30] sm:$0xff]   ;;  %v528_v16 = vlaneseq  ;;  %s1409_s23 = smov 96   ;;  %s1410_s25 = smov 95  }
  0x45   : > { %1122 = vmatprep.subr.bf16.mxu0 %v1249_v0  ;;  %1154 = vmatprep.subr.bf16.mxu1 %v1249_v0  ;;  %v1251_v2 = vld [vmem:[%s1569_s7 + $0x28] sm:$0xff]   ;;  %v1252_v3 = vld [vmem:[%s1569_s7 + $0x20] sm:$0xff]   ;;  %v1253_v6 = vld [vmem:[%s1569_s7 + $0x18] sm:$0xff]   ;;  %s1597_s27 = scalar_lea.vmem [#allocation7], %s996_s21  ;;  %s1058_s8 = sshll.u32 %s1395_s18, 10 }
  0x46   : > { %1123 = vmatpush3.bf16.msra.mxu0 %v1249_v0  ;;  %1162 = vmatpush3.bf16.msra.mxu1 %v1249_v0  ;;  %v1257_v4 = vld [vmem:[#allocation2] sm:$0xff]   ;;  %v1254_v7 = vld [vmem:[%s1569_s7 + $0x10] sm:$0xff]   ;;  %v1255_v8 = vld [vmem:[%s1569_s7 + $0x8] sm:$0xff]   ;;  %v529_v17 = vand.u32 127, %v528_v16  ;;  %s806_s6 = sshll.u32 %s1597_s27, 4  ;;  %s1655_s24 = scalar_lea.hbm %s1795_s2, %s1058_s8  ;;  %s1657_s6 = int_to_ptr.vmem [resolvable:$true] %s806_s6 }
  0x47   : > { %1124 = vmatprep.subr.bf16.mxu0 %v1250_v1  ;;  %1155 = vmatprep.subr.bf16.mxu1 %v1250_v1  ;;  %v1258_v5 = vld [vmem:[#allocation2 + $0x20] sm:$0xff]   ;;  %v1259_v10 = vld [vmem:[#allocation2 + $0x8] sm:$0xff]   ;;  %v1261_v12 = vld [vmem:[#allocation2 + $0x10] sm:$0xff]   ;;  %s773_s14 = scalar_lea.sflag [#allocation4], %s1563_s0  ;;  %s1319_s11 = scalar_lea.vmem %s1657_s6, 1024 }
  0x48   : > { %1138 = vmatprep.mubr.bf16.mxu0 %v1257_v4  ;;  %1146 = vmatprep.mubr.bf16.mxu1 %v1258_v5  ;;  %v1256_v9 = vld [vmem:[%s1569_s7] sm:$0xff]   ;;  %v1260_v11 = vld [vmem:[#allocation2 + $0x28] sm:$0xff]   ;;  %v1263_v13 = vld [vmem:[#allocation2 + $0x30] sm:$0xff]   ;;  %vm530_vm0 = vcmp.lt.s32.totalorder %v529_v17, 32  ;;  %p1320_p1 = scmp.ne.s32.totalorder %s1657_s6, %s1319_s11  ;;  %p1814_p4 = scmp.ne.s32.totalorder %s1810_s13, 0 }
  0x49   : > { %v1262_v14 = vld [vmem:[#allocation2 + $0x18] sm:$0xff]   ;;  %s1411_s29 = smov [#allocation7]  }
  0x4a   : > { %1125 = vmatpush3.bf16.msra.mxu0 %v1250_v1  ;;  %1163 = vmatpush3.bf16.msra.mxu1 %v1250_v1  ;;  %v1264_v15 = vld [vmem:[#allocation2 + $0x38] sm:$0xff]   ;;  %p1321_p8 = pnand %p1320_p1, %p1814_p4  ;;  %s1323_s12 = sshll.u32 %s1411_s29, 4  ;;  %s1324_s12 = int_to_ptr.vmem [resolvable:$false] %s1323_s12 }
  0x4b   : > { %1126 = vmatprep.subr.bf16.mxu0 %v1251_v2  ;;  %1156 = vmatprep.subr.bf16.mxu1 %v1251_v2  ;;  %s1325_s22 = scalar_lea.vmem %s1324_s12, 2048  ;;  %p1326_p13 = scmp.lt.s32.totalorder %s1657_s6, %s1324_s12 }
  0x4c   : > { %p1322_p12 = pneg %p1321_p8  ;;  %p1327_p0 = scmp.lt.s32.totalorder %s1325_s22, %s1319_s11 }
  0x4e   : > { %1127 = vmatpush3.bf16.msra.mxu0 %v1251_v2  ;;  %1164 = vmatpush3.bf16.msra.mxu1 %v1251_v2  ;;  %p1328_p2 = por %p1327_p0, %p1326_p13 }
  0x4f   : > { %1128 = vmatprep.subr.bf16.mxu0 %v1252_v3  ;;  %1157 = vmatprep.subr.bf16.mxu1 %v1252_v3 }
  0x50   : > { %p1329_p3 = pnand %p1328_p2, %p1322_p12 }
  0x52   : > { %1129 = vmatpush3.bf16.msra.mxu0 %v1252_v3  ;;  %1165 = vmatpush3.bf16.msra.mxu1 %v1252_v3 }
  0x53   : > { %1130 = vmatprep.subr.bf16.mxu0 %v1253_v6  ;;  %1158 = vmatprep.subr.bf16.mxu1 %v1253_v6 }
  0x56   : > { %1131 = vmatpush3.bf16.msra.mxu0 %v1253_v6  ;;  %1166 = vmatpush3.bf16.msra.mxu1 %v1253_v6 }
  0x57   : > { %1132 = vmatprep.subr.bf16.mxu0 %v1254_v7  ;;  %1159 = vmatprep.subr.bf16.mxu1 %v1254_v7 }
  0x5a   : > { %1133 = vmatpush3.bf16.msra.mxu0 %v1254_v7  ;;  %1167 = vmatpush3.bf16.msra.mxu1 %v1254_v7 }
  0x5b   : > { %1134 = vmatprep.subr.bf16.mxu0 %v1255_v8  ;;  %1160 = vmatprep.subr.bf16.mxu1 %v1255_v8 }
  0x5e   : > { %1135 = vmatpush3.bf16.msra.mxu0 %v1255_v8  ;;  %1168 = vmatpush3.bf16.msra.mxu1 %v1255_v8 }
  0x5f   : > { %1136 = vmatprep.subr.bf16.mxu0 %v1256_v9  ;;  %1161 = vmatprep.subr.bf16.mxu1 %v1256_v9 }
  0x62   : > { %1137 = vmatpush3.bf16.msra.mxu0 %v1256_v9  ;;  %1169 = vmatpush3.bf16.msra.mxu1 %v1256_v9 }
  0x65   : > { %1139 = vmatmul.mubr.bf16.vlgmr.msra.gmra.mxu0 %v1259_v10  ;;  %1147 = vmatmul.mubr.bf16.vlgmr.msra.gmra.mxu1 %v1260_v11 }
  0x66   : > { %1142 = vmatprep.mubr.bf16.mxu0 %v1261_v12  ;;  %1150 = vmatprep.mubr.bf16.mxu1 %v1263_v13 }
  0x6d   : > { %1143 = vmatmul.mubr.bf16.gmra.mxu0 %v1262_v14  ;;  %1151 = vmatmul.mubr.bf16.gmra.mxu1 %v1264_v15 }
 0x125   : > { %v1140_v18 = vpop.f32.mrf.mxu0  ;;  %v1148_v19 = vpop.f32.mrf.mxu1 }
 0x126   : > { %663 = vrot.lane.b32.xlu0 %v1148_v19, %s1409_s23  ;;  %647 = vrot.lane.b32.xlu1 %v1140_v18, %s1409_s23  ;;  %v533_v24 = vsel %vm530_vm0, %v1140_v18, 0.0  ;;  %v541_v25 = vsel %vm530_vm0, %v1148_v19, 0.0 }
 0x127   : > { %v465_v20 = vpop.f32.mrf.mxu0  ;;  %v497_v21 = vpop.f32.mrf.mxu1 }
 0x128   : > { %v531_v32 = vsel %vm530_vm0, %v465_v20, 0.0  ;;  %v539_v33 = vsel %vm530_vm0, %v497_v21, 0.0 }
 0x129   : > { %v1141_v22 = vpop.f32.mrf.mxu0  ;;  %v1149_v23 = vpop.f32.mrf.mxu1 }
 0x12a   : > { %v534_v26 = vsel %vm530_vm0, %v1141_v22, 0.0  ;;  %v542_v27 = vsel %vm530_vm0, %v1149_v23, 0.0  ;;  %712 = vrot.lane.b32.xlu0 %v1140_v18, %s1410_s25  ;;  %649 = vrot.lane.b32.xlu1 %v1141_v22, %s1409_s23 }
 0x12b   : > { %v1067_v28 = vpack.c.bf16 %v534_v26, %v533_v24  ;;  %v1087_v29 = vpack.c.bf16 %v542_v27, %v541_v25  ;;  %v468_v30 = vpop.f32.mrf.mxu0  ;;  %v500_v31 = vpop.f32.mrf.mxu1 }
 0x12c   : > { %v532_v34 = vsel %vm530_vm0, %v468_v30, 0.0  ;;  %v540_v35 = vsel %vm530_vm0, %v500_v31, 0.0 }
 0x12d   : > { %1099 = vst [vmem:[%s1597_s27 + $0x8] sm:$0xff] %v1067_v28   ;;  %1103 = vst [vmem:[%s1597_s27 + $0x28] sm:$0xff] %v1087_v29   ;;  %v1062_v36 = vpack.c.bf16 %v532_v34, %v531_v32  ;;  %v1082_v37 = vpack.c.bf16 %v540_v35, %v539_v33  ;;  %v1144_v38 = vpop.f32.mrf.mxu0  ;;  %v1601_v39 = vpop.f32.mrf.mxu1 }
 0x12e   : > { %728 = vrot.lane.b32.xlu0 %v1148_v19, %s1410_s25  ;;  %665 = vrot.lane.b32.xlu1 %v1149_v23, %s1409_s23  ;;  %v537_v42 = vsel %vm530_vm0, %v1144_v38, 0.0  ;;  %v545_v43 = vsel %vm530_vm0, %v1601_v39, 0.0 }
 0x12f   : > { %1063 = vst [vmem:[%s1597_s27] sm:$0xff] %v1062_v36   ;;  %1102 = vst [vmem:[%s1597_s27 + $0x20] sm:$0xff] %v1082_v37   ;;  %v1607_v40 = vpop.f32.mrf.mxu0  ;;  %v1609_v41 = vpop.f32.mrf.mxu1 }
 0x130   : > { %v535_v46 = vsel %vm530_vm0, %v1607_v40, 0.0  ;;  %v543_v48 = vsel %vm530_vm0, %v1609_v41, 0.0 }
 0x131   : > { %v1145_v44 = vpop.f32.mrf.mxu0  ;;  %v1614_v45 = vpop.f32.mrf.mxu1 }
 0x132   : > { %643 = vrot.lane.b32.xlu0 %v465_v20, %s1409_s23  ;;  %714 = vrot.lane.b32.xlu1 %v1141_v22, %s1410_s25  ;;  %v538_v47 = vsel %vm530_vm0, %v1145_v44, 0.0  ;;  %v546_v49 = vsel %vm530_vm0, %v1614_v45, 0.0 }
 0x133   : > { %v1077_v50 = vpack.c.bf16 %v538_v47, %v537_v42  ;;  %v484_v51 = vpop.f32.mrf.mxu0  ;;  %v1097_v52 = vpack.c.bf16 %v546_v49, %v545_v43  ;;  %v516_v53 = vpop.f32.mrf.mxu1 }
 0x134   : > { %v536_v54 = vsel %vm530_vm0, %v484_v51, 0.0  ;;  %v544_v55 = vsel %vm530_vm0, %v516_v53, 0.0 }
 0x135   : > { %1101 = vst [vmem:[%s1597_s27 + $0x18] sm:$0xff] %v1077_v50   ;;  %v1072_v56 = vpack.c.bf16 %v536_v54, %v535_v46  ;;  %1105 = vst [vmem:[%s1597_s27 + $0x38] sm:$0xff] %v1097_v52   ;;  %v1092_v57 = vpack.c.bf16 %v544_v55, %v543_v48 }
 0x136   : > { %659 = vrot.lane.b32.xlu0 %v497_v21, %s1409_s23  ;;  %730 = vrot.lane.b32.xlu1 %v1149_v23, %s1410_s25 }
 0x137   : > { %1100 = vst [vmem:[%s1597_s27 + $0x10] sm:$0xff] %v1072_v56   ;;  %1104 = vst [vmem:[%s1597_s27 + $0x30] sm:$0xff] %v1092_v57  }
 0x13a   : > { %708 = vrot.lane.b32.xlu0 %v465_v20, %s1410_s25  ;;  %661 = vrot.lane.b32.xlu1 %v500_v31, %s1409_s23 }
 0x13e   : > { %724 = vrot.lane.b32.xlu0 %v497_v21, %s1410_s25  ;;  %710 = vrot.lane.b32.xlu1 %v468_v30, %s1410_s25 }
 0x142   : > { %726 = vrot.lane.b32.xlu1 %v500_v31, %s1410_s25  ;;  %645 = vrot.lane.b32.xlu0 %v468_v30, %s1409_s23 }
 0x146   : > { %655 = vrot.lane.b32.xlu0 %v1144_v38, %s1409_s23  ;;  %657 = vrot.lane.b32.xlu1 %v1145_v44, %s1409_s23 }
 0x14a   : > { %671 = vrot.lane.b32.xlu0 %v1601_v39, %s1409_s23  ;;  %673 = vrot.lane.b32.xlu1 %v1614_v45, %s1409_s23 }
 0x14e   : > { %720 = vrot.lane.b32.xlu0 %v1144_v38, %s1410_s25  ;;  %722 = vrot.lane.b32.xlu1 %v1145_v44, %s1410_s25 }
 0x152   : > { %651 = vrot.lane.b32.xlu0 %v1607_v40, %s1409_s23  ;;  %653 = vrot.lane.b32.xlu1 %v484_v51, %s1409_s23 }
 0x156   : > { %667 = vrot.lane.b32.xlu0 %v1609_v41, %s1409_s23  ;;  %669 = vrot.lane.b32.xlu1 %v516_v53, %s1409_s23 }
 0x157   : > { %1332 = shalt.err (!%p1329_p3)
}
 0x158   : > { %s1333_s21 = scalar_lea.hbm %s1655_s24, 1024  ;;  %s1337_s23 = scalar_lea.hbm %s1795_s2, 3072 }
 0x159   : > { %p1334_p5 = scmp.ne.s32.totalorder %s1655_s24, %s1333_s21  ;;  %p1338_p9 = scmp.lt.s32.totalorder %s1655_s24, %s1795_s2 }
 0x15a   : > { %p1339_p11 = scmp.lt.s32.totalorder %s1337_s23, %s1333_s21 }
 0x15b   : > { %p1335_p7 = pnand %p1334_p5, %p1814_p4 }
 0x15c   : > { %p1340_p10 = por %p1339_p11, %p1338_p9 }
 0x15d   : > { %p1336_p6 = pneg %p1335_p7 }
 0x15f   : > { %p1341_p1 = pnand %p1340_p10, %p1336_p6 }
 0x161   : > { %1344 = shalt.err (!%p1341_p1)
}
 0x162   : > { %s1412_s9 = smov 64   ;;  %s1413_s10 = smov 4   ;;  %716 = vrot.lane.b32.xlu0 %v1607_v40, %s1410_s25  ;;  %718 = vrot.lane.b32.xlu1 %v484_v51, %s1410_s25  ;;  %vm691_vm1 = vcmask 7168  }
 0x163   : > { %1176 = dma.vmem_to_hbm [thread:$0]  (%p1814_p4), %s1657_s6, 1024, %s1655_s24, %s773_s14, %s1412_s9, %s1412_s9, %s1413_s10  }
 0x164   : > { %p283_p8 = scmp.lt.s32.totalorder %s1395_s18, 2 }
 0x166   : > { %732 = vrot.lane.b32.xlu0 %v1609_v41, %s1410_s25  ;;  %734 = vrot.lane.b32.xlu1 %v516_v53, %s1410_s25  ;;  %s1824_s18 = smov (!%p283_p8, %s1395_s18), 2 }
 0x167   : > { %s1040_s13 = sshll.u32 %s1824_s18, 7 }
 0x168   : > { %s1700_s24 = scalar_lea.vmem %s1796_s3, %s1040_s13  ;;  %s1709_s18 = scalar_lea.vmem %s1797_s4, %s1040_s13 }
 0x16a   : > { %736 = vrot.lane.b32.xlu0 %v1601_v39, %s1410_s25  ;;  %738 = vrot.lane.b32.xlu1 %v1614_v45, %s1410_s25 }
 0x198   : > { %v664_v58 = vpop.permute.xlu0 %663  ;;  %v648_v59 = vpop.permute.xlu1 %647 }
 0x199   : > { %702 = vst.msk [vmem:[%s1700_s24 + $0x50] sm:$0xff] %vm691_vm1, %v664_v58  ;;  %694 = vst.msk [vmem:[%s1700_s24 + $0x10] sm:$0xff] %vm691_vm1, %v648_v59 }
 0x19c   : > { %v713_v60 = vpop.permute.xlu0 %712  ;;  %v650_v61 = vpop.permute.xlu1 %649 }
 0x19d   : > { %758 = vst.msk [vmem:[%s1709_s18 + $0x10] sm:$0xff] %vm691_vm1, %v713_v60  ;;  %695 = vst.msk [vmem:[%s1700_s24 + $0x18] sm:$0xff] %vm691_vm1, %v650_v61 }
 0x1a0   : > { %v729_v62 = vpop.permute.xlu0 %728  ;;  %v666_v63 = vpop.permute.xlu1 %665 }
 0x1a1   : > { %766 = vst.msk [vmem:[%s1709_s18 + $0x50] sm:$0xff] %vm691_vm1, %v729_v62  ;;  %703 = vst.msk [vmem:[%s1700_s24 + $0x58] sm:$0xff] %vm691_vm1, %v666_v63 }
 0x1a4   : > { %v644_v0 = vpop.permute.xlu0 %643  ;;  %v715_v1 = vpop.permute.xlu1 %714 }
 0x1a5   : > { %692 = vst.msk [vmem:[%s1700_s24] sm:$0xff] %vm691_vm1, %v644_v0  ;;  %759 = vst.msk [vmem:[%s1709_s18 + $0x18] sm:$0xff] %vm691_vm1, %v715_v1 }
 0x1a8   : > { %v660_v2 = vpop.permute.xlu0 %659  ;;  %v731_v3 = vpop.permute.xlu1 %730 }
 0x1a9   : > { %700 = vst.msk [vmem:[%s1700_s24 + $0x40] sm:$0xff] %vm691_vm1, %v660_v2  ;;  %767 = vst.msk [vmem:[%s1709_s18 + $0x58] sm:$0xff] %vm691_vm1, %v731_v3 }
 0x1ac   : > { %v709_v4 = vpop.permute.xlu0 %708  ;;  %v662_v5 = vpop.permute.xlu1 %661 }
 0x1ad   : > { %756 = vst.msk [vmem:[%s1709_s18] sm:$0xff] %vm691_vm1, %v709_v4  ;;  %701 = vst.msk [vmem:[%s1700_s24 + $0x48] sm:$0xff] %vm691_vm1, %v662_v5 }
 0x1b0   : > { %v725_v6 = vpop.permute.xlu0 %724  ;;  %v711_v7 = vpop.permute.xlu1 %710 }
 0x1b1   : > { %764 = vst.msk [vmem:[%s1709_s18 + $0x40] sm:$0xff] %vm691_vm1, %v725_v6  ;;  %757 = vst.msk [vmem:[%s1709_s18 + $0x8] sm:$0xff] %vm691_vm1, %v711_v7 }
 0x1b4   : > { %v727_v8 = vpop.permute.xlu1 %726  ;;  %v646_v9 = vpop.permute.xlu0 %645 }
 0x1b5   : > { %765 = vst.msk [vmem:[%s1709_s18 + $0x48] sm:$0xff] %vm691_vm1, %v727_v8  ;;  %693 = vst.msk [vmem:[%s1700_s24 + $0x8] sm:$0xff] %vm691_vm1, %v646_v9 }
 0x1b8   : > { %v656_v10 = vpop.permute.xlu0 %655  ;;  %v658_v11 = vpop.permute.xlu1 %657 }
 0x1b9   : > { %698 = vst.msk [vmem:[%s1700_s24 + $0x30] sm:$0xff] %vm691_vm1, %v656_v10  ;;  %699 = vst.msk [vmem:[%s1700_s24 + $0x38] sm:$0xff] %vm691_vm1, %v658_v11 }
 0x1bc   : > { %v672_v12 = vpop.permute.xlu0 %671  ;;  %v674_v13 = vpop.permute.xlu1 %673 }
 0x1bd   : > { %706 = vst.msk [vmem:[%s1700_s24 + $0x70] sm:$0xff] %vm691_vm1, %v672_v12  ;;  %707 = vst.msk [vmem:[%s1700_s24 + $0x78] sm:$0xff] %vm691_vm1, %v674_v13 }
 0x1c0   : > { %v721_v14 = vpop.permute.xlu0 %720  ;;  %v723_v15 = vpop.permute.xlu1 %722 }
 0x1c1   : > { %762 = vst.msk [vmem:[%s1709_s18 + $0x30] sm:$0xff] %vm691_vm1, %v721_v14  ;;  %763 = vst.msk [vmem:[%s1709_s18 + $0x38] sm:$0xff] %vm691_vm1, %v723_v15 }
 0x1c4   : > { %v652_v16 = vpop.permute.xlu0 %651  ;;  %v654_v17 = vpop.permute.xlu1 %653 }
 0x1c5   : > { %696 = vst.msk [vmem:[%s1700_s24 + $0x20] sm:$0xff] %vm691_vm1, %v652_v16  ;;  %697 = vst.msk [vmem:[%s1700_s24 + $0x28] sm:$0xff] %vm691_vm1, %v654_v17 }
 0x1c8   : > { %v668_v18 = vpop.permute.xlu0 %667  ;;  %v670_v19 = vpop.permute.xlu1 %669 }
 0x1c9   : > { %704 = vst.msk [vmem:[%s1700_s24 + $0x60] sm:$0xff] %vm691_vm1, %v668_v18  ;;  %705 = vst.msk [vmem:[%s1700_s24 + $0x68] sm:$0xff] %vm691_vm1, %v670_v19 }
 0x1d4   : > { %v717_v20 = vpop.permute.xlu0 %716  ;;  %v719_v21 = vpop.permute.xlu1 %718 }
 0x1d5   : > { %760 = vst.msk [vmem:[%s1709_s18 + $0x20] sm:$0xff] %vm691_vm1, %v717_v20  ;;  %761 = vst.msk [vmem:[%s1709_s18 + $0x28] sm:$0xff] %vm691_vm1, %v719_v21 }
 0x1d8   : > { %v733_v22 = vpop.permute.xlu0 %732  ;;  %v735_v23 = vpop.permute.xlu1 %734 }
 0x1d9   : > { %768 = vst.msk [vmem:[%s1709_s18 + $0x60] sm:$0xff] %vm691_vm1, %v733_v22  ;;  %769 = vst.msk [vmem:[%s1709_s18 + $0x68] sm:$0xff] %vm691_vm1, %v735_v23 }
 0x1dc   : > { %v737_v24 = vpop.permute.xlu0 %736  ;;  %v739_v25 = vpop.permute.xlu1 %738 }
 0x1dd   : > { %770 = vst.msk [vmem:[%s1709_s18 + $0x70] sm:$0xff] %vm691_vm1, %v737_v24  ;;  %771 = vst.msk [vmem:[%s1709_s18 + $0x78] sm:$0xff] %vm691_vm1, %v739_v25 }
 0x1de PF: > { %p1193_p4 = scmp.ge.s32.totalorder %s1403_s20, 2  ;;  %s829_s11 = sand.u32 1, %s1383_s15  }
 0x1df   : > { %p1815_p12 = scmp.ne.s32.totalorder %s1805_s26, 0  ;;  %s830_s29 = scalar_lea.sflag [#allocation4], %s829_s11 }
 0x1e1   : > { %p1187_p13 = pnand %p1193_p4, %p1815_p12 }
 0x1e3   : > { %p1188_p0 = pneg %p1187_p13 }
 0x1e5   : > { %1378 = dma.done.wait (%p1188_p0), %s830_s29, 1024  }
 0x1e6   : > { %1380 = vsyncadd (%p1188_p0), %s830_s29, 4294966272  ;;  %s22_s20 = sadd.s32 1, %s1403_s20   ;;  %s1816_s15 = smov %s1387_s16 }
 0x1e7   : > { %p19_p2 = scmp.ge.s32.totalorder %s22_s20, 5   ;;  %s1817_s16 = smov %s1391_s17 }
 0x1e8   : > { %s1818_s17 = smov %s1537_s28  ;;  %s1819_s18 = smov %s1399_s19 }
 0x1e9   : > { %s1820_s19 = smov %s1822_s5  ;;  %21 = sbr.rel (!%p19_p2) target bundleno = 9 (0x9), region = 103 }
 0x1ee   :  { %859 = vsyncpa [#allocation3], 1 }
 0x1ef   :  { %861 = vsyncpa [#allocation3 + $0x1], 1 }
 0x1f0   :  { %862 = vsyncpa [#allocation6], 1 }
 0x1f1   :  { %864 = vsyncpa [#allocation6 + $0x1], 1 }
 0x1f2   :  { %865 = vsyncpa [#allocation4], 1 }
 0x1f3   :  { %867 = vsyncpa [#allocation4 + $0x1], 1 }

</bundles_post_ra>
